<compile_context>
chip_gen: v5e
topology: v5e:2x2
jax: 0.10.0
libtpu: 0.0.40
codegen_flags: <defaults>
</compile_context>

<pallas_src>
import functools

import jax
import jax.numpy as jnp
from jax.experimental import pallas as pl
from jax.experimental.pallas import tpu as pltpu

T_TEMP = 3.0
INV_T = 1.0 / T_TEMP
EPS = 1e-7

# Per-input block byte cap: ~2 MiB tiles already reach >=85% of HBM roofline;
# larger VMEM-filling tiles only add spill/compile risk (esp. v7x 64 MiB/TC).
_MAX_BLOCK_BYTES = 2 * 1024 * 1024


def _round_up(x, m):
    return (x + m - 1) // m * m


def _vmem_capacity_bytes():
    try:
        return int(pltpu.get_tpu_info().vmem_capacity_bytes)
    except Exception:
        return 64 * 1024 * 1024  # conservative fallback (v7x per-TC VMEM)


def _num_tensorcores():
    """Best-effort TensorCores-per-chip (1 on v5e/v6e, 2 on v7x)."""
    try:
        info = pltpu.get_tpu_info()
        for attr in ("num_tensorcores", "tensorcores_per_chip",
                     "tensor_cores_per_chip", "num_cores_per_chip"):
            if hasattr(info, attr):
                v = int(getattr(info, attr))
                if v >= 1:
                    return min(v, 2)
    except Exception:
        pass
    try:
        kind = jax.devices()[0].device_kind.lower()
        if "v7" in kind or "7x" in kind:
            return 2
    except Exception:
        pass
    return 1


def _kl_kernel(pred_ref, label_ref, out_ref, acc_ref, *, n_rows, block_rows,
               blocks_per_split, has_tail):
    split = pl.program_id(0)   # "parallel" split (megacore on v7x)
    i = pl.program_id(1)       # row-block within this split ("arbitrary")

    @pl.when(i == 0)
    def _():
        acc_ref[split] = jnp.zeros(acc_ref.shape[1:], acc_ref.dtype)

    def contrib_of():
        p = pred_ref[...].astype(jnp.float32) * INV_T
        l = label_ref[...].astype(jnp.float32) * INV_T
        # log_softmax(pred / T) along the class (lane) axis.
        p_shift = p - jnp.max(p, axis=1, keepdims=True)
        log_predict = p_shift - jnp.log(
            jnp.sum(jnp.exp(p_shift), axis=1, keepdims=True))
        # softmax(label / T) + eps along the class (lane) axis.
        l_exp = jnp.exp(l - jnp.max(l, axis=1, keepdims=True))
        denom = jnp.sum(l_exp, axis=1, keepdims=True)
        target = l_exp * (1.0 / denom) + EPS   # per-row reciprocal, bcast mul
        # Keep jnp.log(target) (eps inside the log) for parity with PyTorch.
        return target * (jnp.log(target) - log_predict)

    def accumulate(contrib):
        # Collapse 8-row strips onto an (8, C) accumulator with pure VPU adds;
        # the cross-sublane/cross-lane reduce happens once at the final step.
        strips = contrib.reshape(block_rows // 8, 8, contrib.shape[-1])
        acc_ref[split] = acc_ref[split] + jnp.sum(strips, axis=0)

    if has_tail:
        row_start = (split * blocks_per_split + i) * block_rows
        is_tail = row_start + block_rows > n_rows

        @pl.when(jnp.logical_not(is_tail))
        def _():
            # Interior blocks: fully unmasked fast path.
            accumulate(contrib_of())

        @pl.when(is_tail)
        def _():
            # Only the single globally-last block pays for the mask. Garbage
            # padded rows may produce NaN/Inf, but a TPU select does not
            # propagate them, so masking the contribution alone suffices.
            row_ids = jax.lax.broadcasted_iota(
                jnp.int32, (block_rows, 1), 0) + row_start
            accumulate(jnp.where(row_ids < n_rows, contrib_of(), 0.0))
    else:
        accumulate(contrib_of())

    @pl.when(i == pl.num_programs(1) - 1)
    def _():
        out_ref[0, 0] = jnp.sum(acc_ref[split])


def kl_loss(pred, label, *, block_rows=None, num_splits=None):
    """Pallas KLLoss.forward. pred, label: (N, C). Returns scalar f32."""
    assert pred.shape == label.shape and pred.ndim == 2
    n, c = pred.shape
    assert n >= 1

    itemsize = pred.dtype.itemsize
    # Sublane packing alignment: 8 rows for f32, 16 for bf16/f16, 32 for 8-bit.
    row_align = max(8, 32 // max(itemsize, 1))

    if num_splits is None:
        num_splits = _num_tensorcores()
    num_splits = max(1, int(num_splits))

    vmem_cap = _vmem_capacity_bytes()
    vmem_budget = int(vmem_cap * 0.6)

    if block_rows is None:
        max_block_bytes = min(_MAX_BLOCK_BYTES,
                              max(vmem_budget // 12, row_align * c * 4))
        block_rows = max(row_align,
                         (max_block_bytes // (c * 4)) // row_align * row_align)
    block_rows = min(block_rows, _round_up(n, row_align))
    assert block_rows % row_align == 0 and block_rows % 8 == 0

    # Balance the split so both halves get equal block counts and no program
    # is ever fully padded (would duplicate HBM reads on a mem-bound kernel).
    if num_splits > 1:
        nbps = pl.cdiv(pl.cdiv(n, block_rows), num_splits)
        block_rows = _round_up(pl.cdiv(n, num_splits * nbps), row_align)
        if (num_splits * nbps - 1) * block_rows >= n:
            num_splits = 1  # tiny batch: split buys nothing, only padding
    if num_splits == 1:
        nbps = pl.cdiv(n, block_rows)

    total_blocks = num_splits * nbps
    assert (total_blocks - 1) * block_rows < n  # every program reads live rows
    has_tail = total_blocks * block_rows > n

    def in_index(s, i):
        return (s * nbps + i, 0)

    kernel = functools.partial(
        _kl_kernel, n_rows=n, block_rows=block_rows,
        blocks_per_split=nbps, has_tail=has_tail)

    partials = pl.pallas_call(
        kernel,
        out_shape=jax.ShapeDtypeStruct((num_splits, 1), jnp.float32),
        grid_spec=pltpu.PrefetchScalarGridSpec(
            num_scalar_prefetch=0,
            grid=(num_splits, nbps),
            in_specs=[
                pl.BlockSpec((block_rows, c), in_index),
                pl.BlockSpec((block_rows, c), in_index),
            ],
            out_specs=pl.BlockSpec(
                (1, 1), lambda s, i: (s, 0), memory_space=pltpu.SMEM),
            scratch_shapes=[pltpu.VMEM((num_splits, 8, c), jnp.float32)],
        ),
        compiler_params=pltpu.CompilerParams(
            dimension_semantics=("parallel", "arbitrary"),
            vmem_limit_bytes=vmem_budget,
        ),
        cost_estimate=pl.CostEstimate(
            flops=int(10 * n * c),
            transcendentals=int(3 * n * c),
            bytes_accessed=int(2 * n * c * itemsize + num_splits * 4),
        ),
    )(pred, label)

    return (T_TEMP * T_TEMP) * jnp.sum(partials) / jnp.float32(n)


def _kl_loss_ref(pred, label):
    p = jax.nn.log_softmax(pred.astype(jnp.float32) / T_TEMP, axis=1)
    t = jax.nn.softmax(label.astype(jnp.float32) / T_TEMP, axis=1) + EPS
    return T_TEMP * T_TEMP * jnp.sum(t * (jnp.log(t) - p)) / pred.shape[0]


if __name__ == "__main__":
    key = jax.random.PRNGKey(0)
    k1, k2 = jax.random.split(key)

    # Primary small test: batch=8, classes=32.
    N, C = 8, 32
    pred = jax.random.normal(k1, (N, C), dtype=jnp.float32)
    label = jax.random.normal(k2, (N, C), dtype=jnp.float32)
    out = jax.block_until_ready(kl_loss(pred, label))
    ref = _kl_loss_ref(pred, label)
    assert jnp.allclose(out, ref, rtol=1e-5, atol=1e-5), (out, ref)

    # Ragged-batch test (N not a multiple of the block) exercising the masked
    # tail path and the balanced-split logic.
    N2, C2 = 20, 32
    k3, k4 = jax.random.split(k1)
    pred2 = jax.random.normal(k3, (N2, C2), dtype=jnp.float32)
    label2 = jax.random.normal(k4, (N2, C2), dtype=jnp.float32)
    out2 = jax.block_until_ready(kl_loss(pred2, label2))
    ref2 = _kl_loss_ref(pred2, label2)
    assert jnp.allclose(out2, ref2, rtol=1e-5, atol=1e-5), (out2, ref2)

    # bf16 input path (upcast in-kernel, no wrapper-side cast).
    pred3 = pred2.astype(jnp.bfloat16)
    label3 = label2.astype(jnp.bfloat16)
    out3 = jax.block_until_ready(kl_loss(pred3, label3))
    ref3 = _kl_loss_ref(pred3, label3)
    assert jnp.allclose(out3, ref3, rtol=2e-2, atol=2e-2), (out3, ref3)

    print("KERNEL_OK")
</pallas_src>

<mosaic_0001>
module attributes {stable_mosaic.version = 11 : i64} {
  func.func @_kl_kernel(%arg0: i32, %arg1: i32, %arg2: memref<8x32xf32, #tpu.memory_space<vmem>>, %arg3: memref<8x32xf32, #tpu.memory_space<vmem>>, %arg4: memref<1x1xf32, #tpu.memory_space<smem>>, %arg5: memref<1x8x32xf32, #tpu.memory_space<vmem>>) attributes {dimension_semantics = [#tpu.dimension_semantics<parallel>, #tpu.dimension_semantics<arbitrary>], iteration_bounds = array<i64: 1, 1>, scalar_prefetch = 0 : i64, scratch_operands = 1 : i64, tpu.core_type = #tpu.core_type<tc>, window_params = [{transform_indices = @transform_0, window_bounds = array<i64: 8, 32>}, {transform_indices = @transform_1, window_bounds = array<i64: 8, 32>}, {transform_indices = @transform_2, window_bounds = array<i64: 1, 1>}]} {
    %c0_i32 = arith.constant 0 : i32
    %0 = arith.cmpi eq, %arg1, %c0_i32 : i32
    %1 = arith.extui %0 : i1 to i32
    %c0_i32_0 = arith.constant 0 : i32
    %2 = arith.cmpi ne, %1, %c0_i32_0 : i32
    scf.if %2 {
      %cst_18 = arith.constant 0.000000e+00 : f32
      %48 = vector.broadcast %cst_18 : f32 to vector<8x32xf32>
      %49 = arith.index_cast %arg0 : i32 to index
      %c0_19 = arith.constant 0 : index
      %c0_20 = arith.constant 0 : index
      %50 = vector.load %arg5[%49, %c0_19, %c0_20] : memref<1x8x32xf32, #tpu.memory_space<vmem>>, vector<1x8x32xf32>
      %51 = vector.shape_cast %50 : vector<1x8x32xf32> to vector<8x32xf32>
      %52 = vector.shape_cast %48 : vector<8x32xf32> to vector<1x8x32xf32>
      tpu.vector_store %arg5[%49, %c0_19, %c0_20], %52 {strides = array<i32>} : memref<1x8x32xf32, #tpu.memory_space<vmem>>, vector<1x8x32xf32>,
    } else {
    }
    %c0 = arith.constant 0 : index
    %c0_1 = arith.constant 0 : index
    %3 = vector.load %arg2[%c0, %c0_1] : memref<8x32xf32, #tpu.memory_space<vmem>>, vector<8x32xf32>
    %cst = arith.constant 0.333333343 : f32
    %4 = vector.broadcast %cst : f32 to vector<8x32xf32>
    %5 = arith.mulf %3, %4 : vector<8x32xf32>
    %c0_2 = arith.constant 0 : index
    %c0_3 = arith.constant 0 : index
    %6 = vector.load %arg3[%c0_2, %c0_3] : memref<8x32xf32, #tpu.memory_space<vmem>>, vector<8x32xf32>
    %cst_4 = arith.constant 0.333333343 : f32
    %7 = vector.broadcast %cst_4 : f32 to vector<8x32xf32>
    %8 = arith.mulf %6, %7 : vector<8x32xf32>
    %cst_5 = arith.constant dense<0xFF800000> : vector<8xf32>
    %9 = vector.multi_reduction <maximumf>, %5, %cst_5 [1] : vector<8x32xf32> to vector<8xf32>
    %10 = vector.shape_cast %9 : vector<8xf32> to vector<8x1xf32>
    %11 = vector.broadcast %10 : vector<8x1xf32> to vector<8x32xf32>
    %12 = arith.subf %5, %11 : vector<8x32xf32>
    %13 = math.exp %12 : vector<8x32xf32>
    %cst_6 = arith.constant dense<0.000000e+00> : vector<8xf32>
    %14 = vector.multi_reduction <add>, %13, %cst_6 [1] : vector<8x32xf32> to vector<8xf32>
    %15 = vector.shape_cast %14 : vector<8xf32> to vector<8x1xf32>
    %16 = math.log %15 : vector<8x1xf32>
    %17 = vector.broadcast %16 : vector<8x1xf32> to vector<8x32xf32>
    %18 = arith.subf %12, %17 : vector<8x32xf32>
    %cst_7 = arith.constant dense<0xFF800000> : vector<8xf32>
    %19 = vector.multi_reduction <maximumf>, %8, %cst_7 [1] : vector<8x32xf32> to vector<8xf32>
    %20 = vector.shape_cast %19 : vector<8xf32> to vector<8x1xf32>
    %21 = vector.broadcast %20 : vector<8x1xf32> to vector<8x32xf32>
    %22 = arith.subf %8, %21 : vector<8x32xf32>
    %23 = math.exp %22 : vector<8x32xf32>
    %cst_8 = arith.constant dense<0.000000e+00> : vector<8xf32>
    %24 = vector.multi_reduction <add>, %23, %cst_8 [1] : vector<8x32xf32> to vector<8xf32>
    %25 = vector.shape_cast %24 : vector<8xf32> to vector<8x1xf32>
    %cst_9 = arith.constant 1.000000e+00 : f32
    %26 = vector.broadcast %cst_9 : f32 to vector<8x1xf32>
    %27 = arith.divf %26, %25 : vector<8x1xf32>
    %28 = vector.broadcast %27 : vector<8x1xf32> to vector<8x32xf32>
    %29 = arith.mulf %23, %28 : vector<8x32xf32>
    %cst_10 = arith.constant 1.000000e-07 : f32
    %30 = vector.broadcast %cst_10 : f32 to vector<8x32xf32>
    %31 = arith.addf %29, %30 : vector<8x32xf32>
    %32 = math.log %31 : vector<8x32xf32>
    %33 = arith.subf %32, %18 : vector<8x32xf32>
    %34 = arith.mulf %31, %33 : vector<8x32xf32>
    %35 = vector.shape_cast %34 : vector<8x32xf32> to vector<1x8x32xf32>
    %36 = arith.index_cast %arg0 : i32 to index
    %c0_11 = arith.constant 0 : index
    %c0_12 = arith.constant 0 : index
    %37 = vector.load %arg5[%36, %c0_11, %c0_12] : memref<1x8x32xf32, #tpu.memory_space<vmem>>, vector<1x8x32xf32>
    %38 = vector.shape_cast %37 : vector<1x8x32xf32> to vector<8x32xf32>
    %cst_13 = arith.constant dense<0.000000e+00> : vector<8x32xf32>
    %39 = vector.multi_reduction <add>, %35, %cst_13 [0] : vector<1x8x32xf32> to vector<8x32xf32>
    %40 = arith.addf %38, %39 : vector<8x32xf32>
    %41 = arith.index_cast %arg0 : i32 to index
    %c0_14 = arith.constant 0 : index
    %c0_15 = arith.constant 0 : index
    %42 = vector.load %arg5[%41, %c0_14, %c0_15] : memref<1x8x32xf32, #tpu.memory_space<vmem>>, vector<1x8x32xf32>
    %43 = vector.shape_cast %42 : vector<1x8x32xf32> to vector<8x32xf32>
    %44 = vector.shape_cast %40 : vector<8x32xf32> to vector<1x8x32xf32>
    tpu.vector_store %arg5[%41, %c0_14, %c0_15], %44 {strides = array<i32>} : memref<1x8x32xf32, #tpu.memory_space<vmem>>, vector<1x8x32xf32>,
    %c0_i32_16 = arith.constant 0 : i32
    %45 = arith.cmpi eq, %arg1, %c0_i32_16 : i32
    %46 = arith.extui %45 : i1 to i32
    %c0_i32_17 = arith.constant 0 : i32
    %47 = arith.cmpi ne, %46, %c0_i32_17 : i32
    scf.if %47 {
      %48 = arith.index_cast %arg0 : i32 to index
      %c0_18 = arith.constant 0 : index
      %c0_19 = arith.constant 0 : index
      %49 = vector.load %arg5[%48, %c0_18, %c0_19] : memref<1x8x32xf32, #tpu.memory_space<vmem>>, vector<1x8x32xf32>
      %50 = vector.shape_cast %49 : vector<1x8x32xf32> to vector<8x32xf32>
      %51 = vector.shape_cast %50 : vector<8x32xf32> to vector<1x8x32xf32>
      %cst_20 = arith.constant dense<0.000000e+00> : vector<1xf32>
      %52 = vector.multi_reduction <add>, %51, %cst_20 [1, 2] : vector<1x8x32xf32> to vector<1xf32>
      %53 = vector.shape_cast %52 : vector<1xf32> to vector<1x1x1xf32>
      %54 = vector.extract %53[0, 0, 0] : f32 from vector<1x1x1xf32>
      %c0_21 = arith.constant 0 : index
      %c0_22 = arith.constant 0 : index
      %55 = memref.load %arg4[%c0_21, %c0_22] : memref<1x1xf32, #tpu.memory_space<smem>>
      memref.store %54, %arg4[%c0_21, %c0_22] : memref<1x1xf32, #tpu.memory_space<smem>>
    } else {
    }
    return
  }
  func.func @transform_0(%arg0: i32, %arg1: i32) -> (i32, i32) {
    %c1_i32 = arith.constant 1 : i32
    %0 = arith.muli %arg0, %c1_i32 : i32
    %1 = arith.addi %0, %arg1 : i32
    %c0_i32 = arith.constant 0 : i32
    %c0_i32_0 = arith.constant 0 : i32
    return %1, %c0_i32 : i32, i32
  }
  func.func @transform_1(%arg0: i32, %arg1: i32) -> (i32, i32) {
    %c1_i32 = arith.constant 1 : i32
    %0 = arith.muli %arg0, %c1_i32 : i32
    %1 = arith.addi %0, %arg1 : i32
    %c0_i32 = arith.constant 0 : i32
    %c0_i32_0 = arith.constant 0 : i32
    return %1, %c0_i32 : i32, i32
  }
  func.func @transform_2(%arg0: i32, %arg1: i32) -> (i32, i32) {
    %c0_i32 = arith.constant 0 : i32
    %c0_i32_0 = arith.constant 0 : i32
    return %arg0, %c0_i32 : i32, i32
  }
}

</mosaic_0001>

<bundles_post_ra>
// kernel: tpu_custom_call.1
= control target key start
LH: loop header
LB: loop body
LE: loop exit
PB: predicated region body
PF: predicated region fallthrough
CT: control target
= control target key end

     0   :  { %7 = vsyncpa [#allocation4], 0  ;;  %s259_s0 = inlined_call_operand.hbm [shape: f32[8,32], index: 0, kind: input, shape index: {}]   ;;  %s260_s1 = inlined_call_operand.hbm [shape: f32[8,32], index: 1, kind: input, shape index: {}]   ;;  %s261_s2 = inlined_call_operand.hbm [shape: f32[1,1], index: 2, kind: output, shape index: {}]  }
   0x1   :  { %8 = vsyncpa [#allocation7], 0 }
   0x2   :  { %9 = vsyncpa [#allocation5], 0  ;;  %s18_s11 = sshll.u32 %s259_s0, 4  ;;  %s224_s12 = smov [#allocation3]   ;;  %s19_s11 = int_to_ptr.hbm [resolvable:$true] %s18_s11 }
   0x3   :  { %s20_s13 = sshll.u32 %s224_s12, 4  ;;  %s32_s16 = sshll.u32 %s260_s1, 4  ;;  %s21_s13 = int_to_ptr.vmem [resolvable:$true] %s20_s13  ;;  %s33_s16 = int_to_ptr.hbm [resolvable:$true] %s32_s16 }
   0x4   :  { %23 = dma.hbm_to_vmem [thread:$0]  %s19_s11, 128, %s21_s13, [#allocation4]  }
   0x5   :  { %s225_s17 = smov [#allocation6]  }
   0x6   :  { %s34_s18 = sshll.u32 %s225_s17, 4  ;;  %s35_s18 = int_to_ptr.vmem [resolvable:$true] %s34_s18 }
   0x7   :  { %37 = dma.hbm_to_vmem [thread:$0]  %s33_s16, 128, %s35_s18, [#allocation7]  }
   0x8   :  { %218 = dma.done.wait [#allocation4], 128  }
   0x9   :  { %219 = vsyncadd [#allocation4], 4294967168 }
   0xa   :  { %220 = dma.done.wait [#allocation7], 128  }
   0xb   :  { %221 = vsyncadd [#allocation7], 4294967168  ;;  %vm54_vm0 = vcmask 261120   ;;  %v226_v0 = vmov 0.0   ;;  %v58_v1 = vld [vmem:[#allocation6] sm:$0xff]  ;;  %v56_v3 = vld [vmem:[#allocation3] sm:$0xff] }
   0xc   :  { %55 = vst.msk [vmem:[#allocation2] sm:$0xff] %vm54_vm0, %v226_v0  ;;  %v59_v2 = vmul.f32 0.33333334, %v58_v1  ;;  %v57_v5 = vmul.f32 0.33333334, %v56_v3  ;;  %s130_s19 = sshll.u32 %s261_s2, 4  ;;  %s131_s19 = int_to_ptr.hbm [resolvable:$true] %s130_s19 }
   0xd   :  { %s227_s21 = smov [#allocation8]  }
   0xe   :  { %v73_v4 = vsel %vm54_vm0, %v59_v2, -inf  ;;  %v61_v6 = vsel %vm54_vm0, %v57_v5, -inf }
   0xf   :  { %74 = vmax.xlane.f32.xlu0 %v73_v4 }
  0x13   :  { %v105_v37 = vld [vmem:[#allocation2] sm:$0xff] }
  0x17   :  { %62 = vmax.xlane.f32.xlu0 %v61_v6 }
  0x82   :  { %v75_v7 = vpop.xlane.xlu0 %74 }
  0x83   :  { %v76_v8 = vsub.f32 %v59_v2, %v75_v7 }
  0x85   :  { %v77_v9 = vmul.f32 1.442695, %v76_v8 }
  0x87   :  { %148 = vpow2.f32 %v77_v9 }
  0x8a   :  { %v63_v10 = vpop.xlane.xlu0 %62 }
  0x8b   :  { %v64_v11 = vsub.f32 %v57_v5, %v63_v10 }
  0x8d   :  { %v149_v12 = vpop.eup %148  ;;  %v65_v13 = vmul.f32 1.442695, %v64_v11 }
  0x8e   :  { %v79_v14 = vsel %vm54_vm0, %v149_v12, 0.0 }
  0x8f   :  { %150 = vpow2.f32 %v65_v13  ;;  %80 = vadd.xlane.f32.xlu1 %v79_v14 }
  0x95   :  { %v151_v15 = vpop.eup %150 }
  0x96   :  { %v67_v16 = vsel %vm54_vm0, %v151_v15, 0.0 }
  0x97   :  { %68 = vadd.xlane.f32.xlu1 %v67_v16 }
 0x102   :  { %v81_v17 = vpop.xlane.xlu1 %80 }
 0x103   :  { %152 = vrcp.f32 %v81_v17  ;;  %v93_v21 = vand.u32 2147483648, %v81_v17  ;;  %v91_v23 = vand.u32 2147483647, %v81_v17  ;;  %vm87_vm2 = vweird.f32 %v81_v17 }
 0x105   :  { %v94_v26 = vor.u32 1.1754944e-38, %v93_v21  ;;  %vm92_vm4 = vcmp.eq.f32.partialorder %v91_v23, 8.507059e+37 }
 0x109   :  { %v153_v18 = vpop.eup %152 }
 0x10a   :  { %v83_v19 = vmul.f32 %v153_v18, %v81_v17  ;;  %vm88_vm1 = vweird.f32 %v153_v18  ;;  %v69_v24 = vpop.xlane.xlu1 %68 }
 0x10b   :  { %vm89_vm3 = vmor %vm87_vm2, %vm88_vm1  ;;  %154 = vlog2.f32 %v69_v24 }
 0x10c   :  { %v84_v20 = vsub.f32 1.0, %v83_v19 }
 0x10e   :  { %v85_v22 = vmul.f32 %v153_v18, %v84_v20 }
 0x110   :  { %v86_v25 = vadd.f32 %v153_v18, %v85_v22 }
 0x111   :  { %v155_v31 = vpop.eup %154 }
 0x112   :  { %v90_v27 = vsel %vm89_vm3, %v153_v18, %v86_v25  ;;  %v71_v32 = vmul.f32 0.6931472, %v155_v31 }
 0x113   :  { %v95_v28 = vsel %vm92_vm4, %v94_v26, %v90_v27 }
 0x114   :  { %v97_v29 = vmul.f32 %v149_v12, %v95_v28  ;;  %v72_v35 = vsub.f32 %v64_v11, %v71_v32 }
 0x116   :  { %v98_v30 = vadd.f32 1e-07, %v97_v29 }
 0x118   :  { %156 = vlog2.f32 %v98_v30 }
 0x11e   :  { %v157_v33 = vpop.eup %156 }
 0x11f   :  { %v100_v34 = vmul.f32 0.6931472, %v157_v33 }
 0x121   :  { %v101_v36 = vsub.f32 %v100_v34, %v72_v35 }
 0x123   :  { %v102_v38 = vmul.f32 %v101_v36, %v98_v30 }
 0x125   :  { %v107_v39 = vadd.f32 %v105_v37, %v102_v38 }
 0x127   :  { %108 = vst.msk [vmem:[#allocation2] sm:$0xff] %vm54_vm0, %v107_v39 }
 0x12e   :  { %v112_v40 = vld [vmem:[#allocation2] sm:$0xff] }
 0x12f   :  { %v113_v41 = vsel %vm54_vm0, %v112_v40, 0.0 }
 0x130   :  { %114 = vadd.xlane.f32.xlu2 %v113_v41 }
 0x1a3   :  { %v115_v42 = vpop.xlane.xlu2 %114 }
 0x1a4   :  { %v116_v43 = vrot.slane %v115_v42, 4 }
 0x1a6   :  { %v117_v44 = vadd.f32 %v116_v43, %v115_v42 }
 0x1a8   :  { %v118_v45 = vrot.slane %v117_v44, 2 }
 0x1aa   :  { %v119_v46 = vadd.f32 %v118_v45, %v117_v44 }
 0x1ac   :  { %v120_v47 = vrot.slane %v119_v46, 1 }
 0x1ae   :  { %v121_v48 = vadd.f32 %v120_v47, %v119_v46 }
 0x1b0   :  { %142 = vpush %v121_v48 }
 0x1e1   :  { %s143_s20 = spop %142 }
 0x1e2   :  { %124 = sst [smem:[#allocation8]] %s143_s20 }
 0x1e3   :  { %133 = dma.smem_to_hbm %s227_s21, 16, %s131_s19, [#allocation5]  }
 0x1e4   :  { %222 = dma.done.wait [#allocation5], 16  }
 0x1e5   :  { %223 = vsyncadd [#allocation5], 4294967280 }
 0x1e6   :  { %138 = sfence }
 0x1e7   :  { %139 = vsyncpa [#allocation4], 1 }
 0x1e8   :  { %140 = vsyncpa [#allocation7], 1 }
 0x1e9   :  { %141 = vsyncpa [#allocation5], 1 }

</bundles_post_ra>
